<compile_context>
chip_gen: v5e
topology: v5e:2x2
jax: 0.10.0
libtpu: 0.0.40
codegen_flags: <defaults>
</compile_context>

<pallas_src>
import functools

import jax
import jax.numpy as jnp
import numpy as np
from jax.experimental import pallas as pl
from jax.experimental.pallas import tpu as pltpu


def grid_8_neighbor_graph(N):
    """Discrete N x N grid graph, each node connected to its 8 neighbors."""
    n = N ** 2
    dx = [-1, 0, 1, -1, 1, -1, 0, 1]
    dy = [-1, -1, -1, 0, 0, 1, 1, 1]
    A = np.zeros((n, n), dtype=np.float32)
    for x in range(N):
        for y in range(N):
            idx = x * N + y
            for i in range(len(dx)):
                nx_, ny_ = x + dx[i], y + dy[i]
                if 0 <= nx_ < N and 0 <= ny_ < N:
                    A[idx, nx_ * N + ny_] = 1.0
    return A


def _round_up(a, m):
    return ((a + m - 1) // m) * m


def _vmem_capacity_bytes():
    """Physical VMEM of the current chip; conservative (v7x) fallback."""
    try:
        return int(pltpu.get_tpu_info().vmem_capacity_bytes)
    except Exception:
        return 64 << 20


def _gene_dynamics_kernel(a_ref, xrow_ref, y_ref, o_ref, *, b, f_exp, tk,
                          y_resident):
    """grid = (row tiles of A [parallel], column/K tiles of A [arbitrary])."""
    k = pl.program_id(1)

    # Output block index is (i, 0): constant across k, so o_ref is resident
    # and doubles as the f32 accumulator (no scratch, no final copy).
    @pl.when(k == 0)
    def _():
        o_ref[...] = jnp.zeros_like(o_ref)

    if y_resident:
        # y is the full (n_k, dim) Hill term, resident in VMEM; slice out the
        # K-chunk matching this A column tile.
        start = pl.multiple_of(k * tk, tk)
        y_blk = y_ref[pl.ds(start, tk), :]
    else:
        y_blk = y_ref[...]

    # True low-precision MXU path (bf16 x bf16 when precision="bf16"),
    # f32 accumulation into the resident output block.
    o_ref[...] += jnp.dot(a_ref[...], y_blk,
                          preferred_element_type=jnp.float32)

    @pl.when(k == pl.num_programs(1) - 1)
    def _():
        xr = xrow_ref[...]                    # f32 row tile of x
        if f_exp == 1:                        # static python check: skip pow
            decay = -b * xr
        else:
            decay = -b * (xr ** f_exp)
        o_ref[...] += decay


def gene_dynamics(A, x, b=1.0, f_exp=1, h_exp=2, *, tm=512, tk=None,
                  precision="bf16", y_resident=None):
    """dX/dt = -b*x^f + A @ (x^h / (x^h + 1)).  A: (n, n), x: (n, dim).

    precision:
      "bf16" (default): A and the Hill term are fed to the MXU as bf16 with
        f32 accumulation. Exact for A only if A is exactly representable in
        bf16 (true for a 0/1 adjacency); the Hill term rounds (~2^-8 rel).
      "f32": fully f32-exact path (use for weighted adjacencies / tight tol).
    """
    assert precision in ("bf16", "f32")
    n, dim = x.shape
    assert A.shape == (n, n)

    orig_dtype = x.dtype
    x = x.astype(jnp.float32)
    # Hoisted Hill nonlinearity: computed exactly once, O(n*dim).
    xh = x ** h_exp
    y = xh / (xh + 1.0)

    if precision == "bf16":
        a_dtype = y_dtype = jnp.bfloat16
    else:
        a_dtype = y_dtype = jnp.float32
    a_bytes = jnp.dtype(a_dtype).itemsize
    y_bytes = jnp.dtype(y_dtype).itemsize

    # Generation-aware defaults: bigger tiles + bigger VMEM cap on 128-MiB
    # chips (v5e/v6e); tighter on 64-MiB v7x.
    vmem_cap = _vmem_capacity_bytes()
    small_vmem = vmem_cap <= (65 << 20)
    if tk is None:
        tk = 4096 if small_vmem else 8192
    vmem_hard_cap = (52 << 20) if small_vmem else (100 << 20)

    # Row tile: multiple of 8, capped near n/2 so gm >= 2 and the "parallel"
    # row axis can shard across both v7x TensorCores.
    tm_eff = _round_up(max(8, min(tm, pl.cdiv(n, 2))), 8)
    # Column (K) tile: full n if it fits in one tile, else a multiple of 128.
    if n <= tk:
        tk_eff = n
    else:
        tk_eff = max(128, (tk // 128) * 128)

    gm = pl.cdiv(n, tm_eff)
    gk = pl.cdiv(n, tk_eff)
    n_m = gm * tm_eff
    n_k = gk * tk_eff

    # Keep y fully VMEM-resident when small (removes the gm*n*dim re-stream).
    if y_resident is None:
        y_resident = (n_k * dim * y_bytes) <= (8 << 20)

    # Ragged n handled by zero padding (zero rows/cols contribute nothing;
    # padded y rows are exactly zero).
    A_p = A.astype(a_dtype)
    if (n_m, n_k) != (n, n):
        A_p = jnp.pad(A_p, ((0, n_m - n), (0, n_k - n)))
    x_p = jnp.pad(x, ((0, n_m - n), (0, 0))) if n_m != n else x
    y_p = y.astype(y_dtype)
    if n_k != n:
        y_p = jnp.pad(y_p, ((0, n_k - n), (0, 0)))

    if y_resident:
        y_spec = pl.BlockSpec((n_k, dim), lambda i, k: (0, 0))
    else:
        y_spec = pl.BlockSpec((tk_eff, dim), lambda i, k: (k, 0))

    # VMEM budget: double-buffered A / x / out tiles + the y buffer(s),
    # with 2x margin, capped per generation.
    y_buf = (n_k * dim * y_bytes) if y_resident else (2 * tk_eff * dim * y_bytes)
    est = (2 * tm_eff * tk_eff * a_bytes     # A tiles (dominant stream)
           + 2 * tm_eff * dim * 4            # x row tiles
           + 2 * tm_eff * dim * 4            # output (accumulator) tiles
           + 2 * y_buf)
    vmem_limit = int(min(max(2 * est, 48 << 20), vmem_hard_cap))

    kernel = functools.partial(
        _gene_dynamics_kernel, b=float(b), f_exp=f_exp, tk=tk_eff,
        y_resident=bool(y_resident))

    out = pl.pallas_call(
        kernel,
        out_shape=jax.ShapeDtypeStruct((n_m, dim), jnp.float32),
        grid_spec=pltpu.PrefetchScalarGridSpec(
            num_scalar_prefetch=0,
            grid=(gm, gk),                                        # K axis last
            in_specs=[
                pl.BlockSpec((tm_eff, tk_eff), lambda i, k: (i, k)),  # A tile
                pl.BlockSpec((tm_eff, dim), lambda i, k: (i, 0)),     # x rows
                y_spec,                                               # Hill y
            ],
            out_specs=pl.BlockSpec((tm_eff, dim), lambda i, k: (i, 0)),
        ),
        compiler_params=pltpu.CompilerParams(
            dimension_semantics=("parallel", "arbitrary"),
            vmem_limit_bytes=vmem_limit,
        ),
    )(A_p, x_p, y_p)

    out = out[:n] if n_m != n else out
    return out.astype(orig_dtype)


class GeneDynamics:
    """Pallas-backed analogue of the PyTorch GeneDynamics nn.Module."""

    def __init__(self, A, b, f=1, h=2, precision="bf16"):
        self.A = A
        self.b = b
        self.f = f
        self.h = h
        self.precision = precision

    def __call__(self, t, x):
        # t is unused (autonomous system), matching the reference module.
        return gene_dynamics(self.A, x, b=self.b, f_exp=self.f,
                             h_exp=self.h, precision=self.precision)


def gene_dynamics_ref(A, x, b=1.0, f_exp=1, h_exp=2):
    """Host float64 reference (independent of TPU matmul precision)."""
    A = np.asarray(A, dtype=np.float64)
    x = np.asarray(x, dtype=np.float64)
    xh = x ** h_exp
    return (-b * (x ** f_exp) + A @ (xh / (xh + 1.0))).astype(np.float32)


if __name__ == "__main__":
    key = jax.random.PRNGKey(0)
    k_small, k_big = jax.random.split(key)
    dim = 16
    b = 1.0

    # --- Small, module-consistent shapes: N=8 grid -> n=64 nodes, dim=16. ---
    N_small = 8
    n_small = N_small ** 2
    A_small_np = grid_8_neighbor_graph(N_small)
    A_small = jnp.asarray(A_small_np, dtype=jnp.float32)
    x_small = jax.random.uniform(k_small, (n_small, dim), dtype=jnp.float32)
    ref_small = gene_dynamics_ref(A_small_np, np.asarray(x_small), b=b)

    # Exact f32 path (resident y).
    out_f32 = jax.block_until_ready(
        gene_dynamics(A_small, x_small, b=b, precision="f32"))
    np.testing.assert_allclose(np.asarray(out_f32), ref_small,
                               rtol=1e-5, atol=1e-5)

    # Exact f32 path, streamed-y fallback.
    out_stream = jax.block_until_ready(
        gene_dynamics(A_small, x_small, b=b, precision="f32",
                      y_resident=False))
    np.testing.assert_allclose(np.asarray(out_stream), ref_small,
                               rtol=1e-5, atol=1e-5)

    # Fast bf16-MXU path (A is 0/1 -> exact; Hill term rounds to bf16).
    model = GeneDynamics(A_small, b)
    out_bf16 = jax.block_until_ready(model(0.0, x_small))
    np.testing.assert_allclose(np.asarray(out_bf16), ref_small,
                               rtol=2e-2, atol=2e-2)

    # --- Larger case: exercises gm > 1, gk > 1, padding, resident-y slicing.
    N_big = 72
    n_big = N_big ** 2
    A_big_np = grid_8_neighbor_graph(N_big)
    A_big = jnp.asarray(A_big_np, dtype=jnp.float32)
    x_big = jax.random.uniform(k_big, (n_big, dim), dtype=jnp.float32)
    ref_big = gene_dynamics_ref(A_big_np, np.asarray(x_big), b=b)

    out_big = jax.block_until_ready(
        gene_dynamics(A_big, x_big, b=b, tk=2048))   # force gk > 1
    np.testing.assert_allclose(np.asarray(out_big), ref_big,
                               rtol=2e-2, atol=2e-2)

    print("KERNEL_OK")
</pallas_src>

<mosaic_0001>
module attributes {stable_mosaic.version = 11 : i64} {
  func.func @_gene_dynamics_kernel(%arg0: i32, %arg1: i32, %arg2: memref<32x64xf32, #tpu.memory_space<vmem>>, %arg3: memref<32x16xf32, #tpu.memory_space<vmem>>, %arg4: memref<64x16xf32, #tpu.memory_space<vmem>>, %arg5: memref<32x16xf32, #tpu.memory_space<vmem>>) attributes {dimension_semantics = [#tpu.dimension_semantics<parallel>, #tpu.dimension_semantics<arbitrary>], iteration_bounds = array<i64: 2, 1>, scalar_prefetch = 0 : i64, scratch_operands = 0 : i64, tpu.core_type = #tpu.core_type<tc>, window_params = [{transform_indices = @transform_0, window_bounds = array<i64: 32, 64>}, {transform_indices = @transform_1, window_bounds = array<i64: 32, 16>}, {pipeline_mode = #tpu.pipeline_mode<synchronous>, transform_indices = @transform_2, window_bounds = array<i64: 64, 16>}, {transform_indices = @transform_3, window_bounds = array<i64: 32, 16>}]} {
    %c0_i32 = arith.constant 0 : i32
    %0 = arith.cmpi eq, %arg1, %c0_i32 : i32
    %1 = arith.extui %0 : i1 to i32
    %c0_i32_0 = arith.constant 0 : i32
    %2 = arith.cmpi ne, %1, %c0_i32_0 : i32
    scf.if %2 {
      %cst_9 = arith.constant 0.000000e+00 : f32
      %15 = vector.broadcast %cst_9 : f32 to vector<32x16xf32>
      %c0_10 = arith.constant 0 : index
      %c0_11 = arith.constant 0 : index
      %16 = vector.load %arg5[%c0_10, %c0_11] : memref<32x16xf32, #tpu.memory_space<vmem>>, vector<32x16xf32>
      tpu.vector_store %arg5[%c0_10, %c0_11], %15 {strides = array<i32>} : memref<32x16xf32, #tpu.memory_space<vmem>>, vector<32x16xf32>,
    } else {
    }
    %c64_i32 = arith.constant 64 : i32
    %3 = arith.muli %arg1, %c64_i32 : i32
    %4 = tpu.assume_multiple %3, 64 : i32
    %5 = arith.index_cast %4 : i32 to index
    %c0 = arith.constant 0 : index
    %6 = vector.load %arg4[%5, %c0] : memref<64x16xf32, #tpu.memory_space<vmem>>, vector<64x16xf32>
    %c0_1 = arith.constant 0 : index
    %c0_2 = arith.constant 0 : index
    %7 = vector.load %arg5[%c0_1, %c0_2] : memref<32x16xf32, #tpu.memory_space<vmem>>, vector<32x16xf32>
    %c0_3 = arith.constant 0 : index
    %c0_4 = arith.constant 0 : index
    %8 = vector.load %arg2[%c0_3, %c0_4] : memref<32x64xf32, #tpu.memory_space<vmem>>, vector<32x64xf32>
    %cst = arith.constant dense<0.000000e+00> : vector<32x16xf32>
    %9 = tpu.matmul %8, %6, %cst {dimension_numbers = #tpu.dot_dimension_numbers<[1], [0], [0], [1], [0, 0, 1, 1], [], []>} : vector<32x64xf32>, vector<64x16xf32>, vector<32x16xf32> -> vector<32x16xf32>
    %10 = arith.addf %7, %9 : vector<32x16xf32>
    %c0_5 = arith.constant 0 : index
    %c0_6 = arith.constant 0 : index
    %11 = vector.load %arg5[%c0_5, %c0_6] : memref<32x16xf32, #tpu.memory_space<vmem>>, vector<32x16xf32>
    tpu.vector_store %arg5[%c0_5, %c0_6], %10 {strides = array<i32>} : memref<32x16xf32, #tpu.memory_space<vmem>>, vector<32x16xf32>,
    %c0_i32_7 = arith.constant 0 : i32
    %12 = arith.cmpi eq, %arg1, %c0_i32_7 : i32
    %13 = arith.extui %12 : i1 to i32
    %c0_i32_8 = arith.constant 0 : i32
    %14 = arith.cmpi ne, %13, %c0_i32_8 : i32
    scf.if %14 {
      %c0_9 = arith.constant 0 : index
      %c0_10 = arith.constant 0 : index
      %15 = vector.load %arg3[%c0_9, %c0_10] : memref<32x16xf32, #tpu.memory_space<vmem>>, vector<32x16xf32>
      %cst_11 = arith.constant -1.000000e+00 : f32
      %16 = vector.broadcast %cst_11 : f32 to vector<32x16xf32>
      %17 = arith.mulf %16, %15 : vector<32x16xf32>
      %c0_12 = arith.constant 0 : index
      %c0_13 = arith.constant 0 : index
      %18 = vector.load %arg5[%c0_12, %c0_13] : memref<32x16xf32, #tpu.memory_space<vmem>>, vector<32x16xf32>
      %19 = arith.addf %18, %17 : vector<32x16xf32>
      %c0_14 = arith.constant 0 : index
      %c0_15 = arith.constant 0 : index
      %20 = vector.load %arg5[%c0_14, %c0_15] : memref<32x16xf32, #tpu.memory_space<vmem>>, vector<32x16xf32>
      tpu.vector_store %arg5[%c0_14, %c0_15], %19 {strides = array<i32>} : memref<32x16xf32, #tpu.memory_space<vmem>>, vector<32x16xf32>,
    } else {
    }
    return
  }
  func.func @transform_0(%arg0: i32, %arg1: i32) -> (i32, i32) {
    %c0_i32 = arith.constant 0 : i32
    return %arg0, %arg1 : i32, i32
  }
  func.func @transform_1(%arg0: i32, %arg1: i32) -> (i32, i32) {
    %c0_i32 = arith.constant 0 : i32
    %c0_i32_0 = arith.constant 0 : i32
    return %arg0, %c0_i32 : i32, i32
  }
  func.func @transform_2(%arg0: i32, %arg1: i32) -> (i32, i32) {
    %c0_i32 = arith.constant 0 : i32
    %c0_i32_0 = arith.constant 0 : i32
    %c0_i32_1 = arith.constant 0 : i32
    return %c0_i32, %c0_i32_0 : i32, i32
  }
  func.func @transform_3(%arg0: i32, %arg1: i32) -> (i32, i32) {
    %c0_i32 = arith.constant 0 : i32
    %c0_i32_0 = arith.constant 0 : i32
    return %arg0, %c0_i32 : i32, i32
  }
}

</mosaic_0001>

<bundles_post_ra>
// kernel: tpu_custom_call.1
= control target key start
LH: loop header
LB: loop body
LE: loop exit
PB: predicated region body
PF: predicated region fallthrough
CT: control target
= control target key end

     0   :  { %s513_s12 = smov 0   ;;  %s515_s13 = smov 0   ;;  %s612_s0 = inlined_call_operand.vmem [shape: f32[64,64], index: 0, kind: input, shape index: {}]   ;;  %s613_s1 = inlined_call_operand.vmem [shape: f32[64,16], index: 1, kind: input, shape index: {}]   ;;  %s614_s2 = inlined_call_operand.vmem [shape: f32[64,16], index: 2, kind: input, shape index: {}]   ;;  %s615_s3 = inlined_call_operand.vmem [shape: f32[64,16], index: 3, kind: output, shape index: {}]  }
   0x1   :  { %s517_s14 = smov 0  }
   0x2 LB: > { %s25_s15 = sadd.s32 1, %s486_s13  ;;  %p406_p0 = scmp.ge.s32.totalorder %s490_s14, 1  ;;  %s490_s14 = sphi %s517_s14, %s13_s14   ;;  %s486_s13 = sphi %s515_s13, %s617_s13   ;;  %s482_s12 = sphi %s513_s12, %s616_s12  }
   0x3   : > { %p27_p1 = scmp.ge.s32.totalorder %s25_s15, 2  ;;  %p166_p2 = scmp.lt.s32.totalorder %s490_s14, 3 }
   0x5   : > { %s619_s15 = smov (%p27_p1, %s25_s15), 0  ;;  %p167_p3 = pnand %p406_p0, %p166_p2 }
   0x6   : > { %s407_s20 = sshll.u32 (!%p167_p3), %s482_s12, 2 }
   0x7   : > { %170 = sbr.rel (%p167_p3) target bundleno = 174 (0xae), region = 32  ;;  %p199_p4 = scmp.lt.s32.totalorder (!%p167_p3), %s407_s20, 7 }
   0xc   : > { %v237_v0 = vld [vmem:[%s614_s2 + $0x38] sm:$0xff]  ;;  %v236_v1 = vld [vmem:[%s614_s2 + $0x30] sm:$0xff]  ;;  %v235_v2 = vld [vmem:[%s614_s2 + $0x28] sm:$0xff]  ;;  %s621_s20 = smov (!%p199_p4, %s407_s20), 7  ;;  %vm223_vm0 = vcmask 130048   ;;  %v492_v6 = vmov 0.0  }
   0xd   : > { %420 = vmatpush.msra.mxu2 %v237_v0  ;;  %421 = vmatpush.msra.mxu3 %v237_v0  ;;  %v234_v3 = vld [vmem:[%s614_s2 + $0x20] sm:$0xff]  ;;  %v233_v4 = vld [vmem:[%s614_s2 + $0x18] sm:$0xff]  ;;  %s546_s27 = sshll.u32 %s621_s20, 3  ;;  %v232_v5 = vld [vmem:[%s614_s2 + $0x10] sm:$0xff]  ;;  %vm246_vm1 = vcmask 523264  }
   0xe   : > { %267 = vmatpush.msra.mxu0 %v237_v0  ;;  %419 = vmatpush.msra.mxu1 %v237_v0  ;;  %s552_s30 = scalar_lea.vmem %s615_s3, %s546_s27  ;;  %v231_v7 = vld [vmem:[%s614_s2 + $0x8] sm:$0xff]  ;;  %s205_s10 = scalar_lea.vmem %s612_s0, %s546_s27  ;;  %v230_v8 = vld [vmem:[%s614_s2] sm:$0xff] }
   0xf   : > { %423 = vmatpush.msra.mxu2 %v236_v1  ;;  %424 = vmatpush.msra.mxu3 %v236_v1  ;;  %224 = vst.msk [vmem:[%s552_s30] sm:$0xff] %vm223_vm0, %v492_v6  ;;  %v244_v9 = vld [vmem:[%s205_s10 + $0x10] sm:$0xff]  ;;  %v245_v10 = vld [vmem:[%s205_s10 + $0x18] sm:$0xff]  ;;  %v242_v11 = vld [vmem:[%s205_s10] sm:$0xff]  ;;  %s211_s18 = scalar_lea.vmem %s613_s1, %s546_s27 }
  0x10   : > { %268 = vmatpush.msra.mxu0 %v236_v1  ;;  %422 = vmatpush.msra.mxu1 %v236_v1  ;;  %225 = vst.msk [vmem:[%s552_s30 + $0x8] sm:$0xff] %vm223_vm0, %v492_v6  ;;  %v243_v12 = vld [vmem:[%s205_s10 + $0x8] sm:$0xff]  ;;  %v300_v25 = vld [vmem:[%s211_s18] sm:$0xff]  ;;  %v302_v27 = vld [vmem:[%s211_s18 + $0x10] sm:$0xff] }
  0x11   : > { %426 = vmatpush.msra.mxu2 %v235_v2  ;;  %427 = vmatpush.msra.mxu3 %v235_v2  ;;  %226 = vst.msk [vmem:[%s552_s30 + $0x10] sm:$0xff] %vm223_vm0, %v492_v6  ;;  %v301_v26 = vld [vmem:[%s211_s18 + $0x8] sm:$0xff]  ;;  %v303_v28 = vld [vmem:[%s211_s18 + $0x18] sm:$0xff]  ;;  %v304_v29 = vmul.f32 -1.0, %v300_v25  ;;  %v306_v31 = vmul.f32 -1.0, %v302_v27 }
  0x12   : > { %269 = vmatpush.msra.mxu0 %v235_v2  ;;  %425 = vmatpush.msra.mxu1 %v235_v2  ;;  %227 = vst.msk [vmem:[%s552_s30 + $0x18] sm:$0xff] %vm223_vm0, %v492_v6  ;;  %v305_v30 = vmul.f32 -1.0, %v301_v26  ;;  %v307_v32 = vmul.f32 -1.0, %v303_v28 }
  0x13   : > { %429 = vmatpush.msra.mxu2 %v234_v3  ;;  %430 = vmatpush.msra.mxu3 %v234_v3 }
  0x14   : > { %270 = vmatpush.msra.mxu0 %v234_v3  ;;  %428 = vmatpush.msra.mxu1 %v234_v3 }
  0x15   : > { %432 = vmatpush.msra.mxu2 %v233_v4  ;;  %433 = vmatpush.msra.mxu3 %v233_v4 }
  0x16   : > { %271 = vmatpush.msra.mxu0 %v233_v4  ;;  %431 = vmatpush.msra.mxu1 %v233_v4  ;;  %v238_v13 = vld [vmem:[%s552_s30] sm:$0xff] }
  0x17   : > { %435 = vmatpush.msra.mxu2 %v232_v5  ;;  %436 = vmatpush.msra.mxu3 %v232_v5  ;;  %v239_v14 = vld [vmem:[%s552_s30 + $0x8] sm:$0xff] }
  0x18   : > { %272 = vmatpush.msra.mxu0 %v232_v5  ;;  %434 = vmatpush.msra.mxu1 %v232_v5  ;;  %v240_v17 = vld [vmem:[%s552_s30 + $0x10] sm:$0xff] }
  0x19   : > { %438 = vmatpush.msra.mxu2 %v231_v7  ;;  %439 = vmatpush.msra.mxu3 %v231_v7  ;;  %v241_v18 = vld [vmem:[%s552_s30 + $0x18] sm:$0xff] }
  0x1a   : > { %273 = vmatpush.msra.mxu0 %v231_v7  ;;  %437 = vmatpush.msra.mxu1 %v231_v7 }
  0x1b   : > { %441 = vmatpush.msra.mxu2 %v230_v8  ;;  %442 = vmatpush.msra.mxu3 %v230_v8 }
  0x1c   : > { %415 = vmatmul.msk.f32.vlgmr.msra.gmra.mxu2 %vm246_vm1, %v244_v9  ;;  %416 = vmatmul.msk.f32.vlgmr.msra.gmra.mxu3 %vm246_vm1, %v245_v10 }
  0x1d   : > { %274 = vmatpush.msra.mxu0 %v230_v8  ;;  %440 = vmatpush.msra.mxu1 %v230_v8 }
  0x1e   : > { %413 = vmatmul.msk.f32.vlgmr.msra.gmra.mxu0 %vm246_vm1, %v242_v11  ;;  %414 = vmatmul.msk.f32.vlgmr.msra.gmra.mxu1 %vm246_vm1, %v243_v12 }
  0x9b   : > { %v276_v15 = vpop.f32.mrf.mxu0  ;;  %v279_v16 = vpop.f32.mrf.mxu1 }
  0x9c   : > { %v288_v19 = vadd.f32 %v276_v15, %v238_v13  ;;  %v289_v20 = vadd.f32 %v279_v16, %v239_v14 }
  0x9e   : > { %293 = vst.msk [vmem:[%s552_s30] sm:$0xff] %vm223_vm0, %v288_v19 }
  0x9f   : > { %v282_v21 = vpop.f32.mrf.mxu2  ;;  %v285_v22 = vpop.f32.mrf.mxu3  ;;  %294 = vst.msk [vmem:[%s552_s30 + $0x8] sm:$0xff] %vm223_vm0, %v289_v20 }
  0xa0   : > { %v290_v23 = vadd.f32 %v282_v21, %v240_v17  ;;  %v291_v24 = vadd.f32 %v285_v22, %v241_v18 }
  0xa2   : > { %295 = vst.msk [vmem:[%s552_s30 + $0x10] sm:$0xff] %vm223_vm0, %v290_v23 }
  0xa3   : > { %296 = vst.msk [vmem:[%s552_s30 + $0x18] sm:$0xff] %vm223_vm0, %v291_v24 }
  0xa5   : > { %v308_v33 = vld [vmem:[%s552_s30] sm:$0xff] }
  0xa6   : > { %v309_v34 = vld [vmem:[%s552_s30 + $0x8] sm:$0xff]  ;;  %v312_v37 = vadd.f32 %v308_v33, %v304_v29 }
  0xa7   : > { %v313_v38 = vadd.f32 %v309_v34, %v305_v30 }
  0xa8   : > { %316 = vst.msk [vmem:[%s552_s30] sm:$0xff] %vm223_vm0, %v312_v37 }
  0xa9   : > { %v310_v35 = vld [vmem:[%s552_s30 + $0x10] sm:$0xff]  ;;  %317 = vst.msk [vmem:[%s552_s30 + $0x8] sm:$0xff] %vm223_vm0, %v313_v38 }
  0xaa   : > { %v311_v36 = vld [vmem:[%s552_s30 + $0x18] sm:$0xff]  ;;  %v314_v39 = vadd.f32 %v310_v35, %v306_v31 }
  0xab   : > { %v315_v40 = vadd.f32 %v311_v36, %v307_v32 }
  0xac   : > { %318 = vst.msk [vmem:[%s552_s30 + $0x10] sm:$0xff] %vm223_vm0, %v314_v39 }
  0xad   : > { %319 = vst.msk [vmem:[%s552_s30 + $0x18] sm:$0xff] %vm223_vm0, %v315_v40 }
  0xae PF: > { %s13_s14 = sadd.s32 1, %s490_s14   ;;  %s616_s12 = smov %s486_s13 }
  0xaf   : > { %p10_p5 = scmp.ge.s32.totalorder %s13_s14, 4   ;;  %s617_s13 = smov %s619_s15 }
  0xb1   :  { %12 = sbr.rel (!%p10_p5) target bundleno = 2 (0x2), region = 74 }

</bundles_post_ra>
